<compile_context>
chip_gen: v5e
topology: v5e:2x2
jax: 0.10.0
libtpu: 0.0.40
codegen_flags: <defaults>
</compile_context>

<pallas_src>
import functools

import jax
import jax.numpy as jnp
from jax.experimental import pallas as pl
from jax.experimental.pallas import tpu as pltpu


# ---------------------------------------------------------------------------
# Kernels
# ---------------------------------------------------------------------------
def _forward_kernel(x_ref, w1t_ref, b1_ref, w2t_ref, b2_ref, out_ref):
    # x: (TB, D); w1t: (D, 3); b1: (1, 3); w2t: (3, 3); b2: (1, 3)
    h = jnp.dot(x_ref[...], w1t_ref[...], preferred_element_type=jnp.float32)
    h = jnp.maximum(h + b1_ref[...], 0.0)                                    # Linear1 + ReLU
    logits = jnp.dot(h, w2t_ref[...], preferred_element_type=jnp.float32) + b2_ref[...]
    out_ref[...] = logits.astype(out_ref.dtype)


def _fused_forward_loss_kernel(x_ref, w1t_ref, b1_ref, w2t_ref, b2_ref, yoh_ref,
                               logits_ref, loss_ref, acc_ref, *, inv_batch):
    i = pl.program_id(0)

    @pl.when(i == 0)
    def _init():
        acc_ref[0, 0] = jnp.float32(0.0)

    # Same forward as _forward_kernel (single pass over x).
    h = jnp.dot(x_ref[...], w1t_ref[...], preferred_element_type=jnp.float32)
    h = jnp.maximum(h + b1_ref[...], 0.0)
    logits = jnp.dot(h, w2t_ref[...], preferred_element_type=jnp.float32) + b2_ref[...]
    logits_ref[...] = logits.astype(logits_ref.dtype)

    # Mean cross-entropy with one-hot labels (== torch.nn.CrossEntropyLoss default).
    m = jnp.max(logits, axis=-1, keepdims=True)                              # (TB, 1)
    lse = jnp.log(jnp.sum(jnp.exp(logits - m), axis=-1, keepdims=True)) + m  # (TB, 1)
    picked = jnp.sum(logits * yoh_ref[...], axis=-1, keepdims=True)          # (TB, 1)
    acc_ref[0, 0] += jnp.sum(lse - picked)                                   # raw sum

    @pl.when(i == pl.num_programs(0) - 1)
    def _finalize():
        loss_ref[0, 0] = acc_ref[0, 0] * inv_batch                           # scale once


# ---------------------------------------------------------------------------
# Wrappers
# ---------------------------------------------------------------------------
def _pick_batch_tile(batch, max_tile=512):
    """Largest row tile <= max_tile (multiple of 8) that divides batch."""
    if batch <= max_tile:
        return batch
    for t in range(max_tile, 7, -8):
        if batch % t == 0:
            return t
    return batch  # fall back to whole batch in a single block


def torch_model_forward(x, params):
    """y_pred = Linear2(ReLU(Linear1(x))) -> (B, 3) float32 logits."""
    w1, b1, w2, b2 = params
    B, D = x.shape
    tb = _pick_batch_tile(B)
    grid = (B // tb,)
    return pl.pallas_call(
        _forward_kernel,
        out_shape=jax.ShapeDtypeStruct((B, 3), jnp.float32),
        grid=grid,
        in_specs=[
            pl.BlockSpec((tb, D), lambda i: (i, 0)),   # x tile
            pl.BlockSpec((D, 3), lambda i: (0, 0)),    # W1^T (pre-transposed)
            pl.BlockSpec((1, 3), lambda i: (0, 0)),    # b1
            pl.BlockSpec((3, 3), lambda i: (0, 0)),    # W2^T (pre-transposed)
            pl.BlockSpec((1, 3), lambda i: (0, 0)),    # b2
        ],
        out_specs=pl.BlockSpec((tb, 3), lambda i: (i, 0)),
        compiler_params=pltpu.CompilerParams(dimension_semantics=("parallel",)),
    )(x, w1.T, b1.reshape(1, 3), w2.T, b2.reshape(1, 3))


def torch_model_forward_and_loss(x, y, params):
    """Single fused pallas_call: returns ((B, 3) logits, scalar mean CE loss)."""
    w1, b1, w2, b2 = params
    B, D = x.shape
    tb = _pick_batch_tile(B)
    grid = (B // tb,)
    y_onehot = jax.nn.one_hot(y, 3, dtype=jnp.float32)

    kernel = functools.partial(_fused_forward_loss_kernel, inv_batch=1.0 / B)
    logits, loss = pl.pallas_call(
        kernel,
        out_shape=(
            jax.ShapeDtypeStruct((B, 3), jnp.float32),   # logits
            jax.ShapeDtypeStruct((1, 1), jnp.float32),   # scalar loss
        ),
        grid=grid,
        in_specs=[
            pl.BlockSpec((tb, D), lambda i: (i, 0)),     # x tile
            pl.BlockSpec((D, 3), lambda i: (0, 0)),      # W1^T
            pl.BlockSpec((1, 3), lambda i: (0, 0)),      # b1
            pl.BlockSpec((3, 3), lambda i: (0, 0)),      # W2^T
            pl.BlockSpec((1, 3), lambda i: (0, 0)),      # b2
            pl.BlockSpec((tb, 3), lambda i: (i, 0)),     # one-hot labels tile
        ],
        out_specs=(
            pl.BlockSpec((tb, 3), lambda i: (i, 0)),                 # logits (VMEM)
            pl.BlockSpec(memory_space=pltpu.SMEM),                   # scalar loss (SMEM)
        ),
        scratch_shapes=[pltpu.SMEM((1, 1), jnp.float32)],            # loss accumulator
        compiler_params=pltpu.CompilerParams(dimension_semantics=("arbitrary",)),
    )(x, w1.T, b1.reshape(1, 3), w2.T, b2.reshape(1, 3), y_onehot)
    return logits, loss[0, 0]


def torch_model(x, params, y=None):
    """Mirrors TorchModel.forward: logits if y is None, else scalar CE loss."""
    if y is None:
        return torch_model_forward(x, params)
    _, loss = torch_model_forward_and_loss(x, y, params)
    return loss


def init_params(input_size, key):
    """Deterministic parameter init (PyTorch nn.Linear shapes)."""
    k1, k2, k3, k4 = jax.random.split(key, 4)
    bound1 = 1.0 / (input_size ** 0.5)
    bound2 = 1.0 / (3 ** 0.5)
    w1 = jax.random.uniform(k1, (3, input_size), jnp.float32, -bound1, bound1)
    b1 = jax.random.uniform(k2, (3,), jnp.float32, -bound1, bound1)
    w2 = jax.random.uniform(k3, (3, 3), jnp.float32, -bound2, bound2)
    b2 = jax.random.uniform(k4, (3,), jnp.float32, -bound2, bound2)
    return (w1, b1, w2, b2)


if __name__ == "__main__":
    key = jax.random.PRNGKey(0)
    kx, ky, kp = jax.random.split(key, 3)

    batch, input_size = 8, 32
    x = jax.random.normal(kx, (batch, input_size), jnp.float32)
    y = jax.random.randint(ky, (batch,), 0, 3, jnp.int32)
    params = init_params(input_size, kp)

    # Inference path: (B, 3) logits.
    y_pred = torch_model(x, params)
    jax.block_until_ready(y_pred)

    # Training path: scalar cross-entropy loss (forward + loss fused in ONE call).
    logits_fused, loss = torch_model_forward_and_loss(x, y, params)
    jax.block_until_ready(loss)

    # Sanity check against pure-JAX reference.
    w1, b1, w2, b2 = params
    h_ref = jnp.maximum(x @ w1.T + b1, 0.0)
    logits_ref = h_ref @ w2.T + b2
    lse_ref = jax.nn.logsumexp(logits_ref, axis=-1)
    loss_ref = jnp.mean(lse_ref - logits_ref[jnp.arange(batch), y])
    assert jnp.allclose(y_pred, logits_ref, atol=1e-5), "logits mismatch"
    assert jnp.allclose(logits_fused, logits_ref, atol=1e-5), "fused logits mismatch"
    assert jnp.allclose(loss, loss_ref, atol=1e-5), "loss mismatch"

    print("KERNEL_OK")
</pallas_src>

<mosaic_0001>
module attributes {stable_mosaic.version = 11 : i64} {
  func.func @_forward_kernel(%arg0: i32, %arg1: memref<8x32xf32, #tpu.memory_space<vmem>>, %arg2: memref<32x3xf32, #tpu.memory_space<vmem>>, %arg3: memref<1x3xf32, #tpu.memory_space<vmem>>, %arg4: memref<3x3xf32, #tpu.memory_space<vmem>>, %arg5: memref<1x3xf32, #tpu.memory_space<vmem>>, %arg6: memref<8x3xf32, #tpu.memory_space<vmem>>) attributes {dimension_semantics = [#tpu.dimension_semantics<parallel>], iteration_bounds = array<i64: 1>, scalar_prefetch = 0 : i64, scratch_operands = 0 : i64, tpu.core_type = #tpu.core_type<tc>, window_params = [{transform_indices = @transform_0, window_bounds = array<i64: 8, 32>}, {pipeline_mode = #tpu.pipeline_mode<synchronous>, transform_indices = @transform_1, window_bounds = array<i64: 32, 3>}, {pipeline_mode = #tpu.pipeline_mode<synchronous>, transform_indices = @transform_2, window_bounds = array<i64: 1, 3>}, {pipeline_mode = #tpu.pipeline_mode<synchronous>, transform_indices = @transform_3, window_bounds = array<i64: 3, 3>}, {pipeline_mode = #tpu.pipeline_mode<synchronous>, transform_indices = @transform_4, window_bounds = array<i64: 1, 3>}, {transform_indices = @transform_5, window_bounds = array<i64: 8, 3>}]} {
    %c0 = arith.constant 0 : index
    %c0_0 = arith.constant 0 : index
    %0 = vector.load %arg1[%c0, %c0_0] : memref<8x32xf32, #tpu.memory_space<vmem>>, vector<8x32xf32>
    %c0_1 = arith.constant 0 : index
    %c0_2 = arith.constant 0 : index
    %1 = vector.load %arg2[%c0_1, %c0_2] : memref<32x3xf32, #tpu.memory_space<vmem>>, vector<32x3xf32>
    %cst = arith.constant dense<0.000000e+00> : vector<8x3xf32>
    %2 = tpu.matmul %0, %1, %cst {dimension_numbers = #tpu.dot_dimension_numbers<[1], [0], [0], [1], [0, 0, 1, 1], [], []>} : vector<8x32xf32>, vector<32x3xf32>, vector<8x3xf32> -> vector<8x3xf32>
    %c0_3 = arith.constant 0 : index
    %c0_4 = arith.constant 0 : index
    %3 = vector.load %arg3[%c0_3, %c0_4] : memref<1x3xf32, #tpu.memory_space<vmem>>, vector<1x3xf32>
    %4 = vector.broadcast %3 : vector<1x3xf32> to vector<8x3xf32>
    %5 = arith.addf %2, %4 : vector<8x3xf32>
    %cst_5 = arith.constant 0.000000e+00 : f32
    %6 = vector.broadcast %cst_5 : f32 to vector<8x3xf32>
    %7 = arith.maximumf %5, %6 : vector<8x3xf32>
    %c0_6 = arith.constant 0 : index
    %c0_7 = arith.constant 0 : index
    %8 = vector.load %arg4[%c0_6, %c0_7] : memref<3x3xf32, #tpu.memory_space<vmem>>, vector<3x3xf32>
    %cst_8 = arith.constant dense<0.000000e+00> : vector<8x3xf32>
    %9 = tpu.matmul %7, %8, %cst_8 {dimension_numbers = #tpu.dot_dimension_numbers<[1], [0], [0], [1], [0, 0, 1, 1], [], []>} : vector<8x3xf32>, vector<3x3xf32>, vector<8x3xf32> -> vector<8x3xf32>
    %c0_9 = arith.constant 0 : index
    %c0_10 = arith.constant 0 : index
    %10 = vector.load %arg5[%c0_9, %c0_10] : memref<1x3xf32, #tpu.memory_space<vmem>>, vector<1x3xf32>
    %11 = vector.broadcast %10 : vector<1x3xf32> to vector<8x3xf32>
    %12 = arith.addf %9, %11 : vector<8x3xf32>
    %c0_11 = arith.constant 0 : index
    %c0_12 = arith.constant 0 : index
    %13 = vector.load %arg6[%c0_11, %c0_12] : memref<8x3xf32, #tpu.memory_space<vmem>>, vector<8x3xf32>
    tpu.vector_store %arg6[%c0_11, %c0_12], %12 {strides = array<i32>} : memref<8x3xf32, #tpu.memory_space<vmem>>, vector<8x3xf32>,
    return
  }
  func.func @transform_0(%arg0: i32) -> (i32, i32) {
    %c0_i32 = arith.constant 0 : i32
    %c0_i32_0 = arith.constant 0 : i32
    return %arg0, %c0_i32 : i32, i32
  }
  func.func @transform_1(%arg0: i32) -> (i32, i32) {
    %c0_i32 = arith.constant 0 : i32
    %c0_i32_0 = arith.constant 0 : i32
    %c0_i32_1 = arith.constant 0 : i32
    return %c0_i32, %c0_i32_0 : i32, i32
  }
  func.func @transform_2(%arg0: i32) -> (i32, i32) {
    %c0_i32 = arith.constant 0 : i32
    %c0_i32_0 = arith.constant 0 : i32
    %c0_i32_1 = arith.constant 0 : i32
    return %c0_i32, %c0_i32_0 : i32, i32
  }
  func.func @transform_3(%arg0: i32) -> (i32, i32) {
    %c0_i32 = arith.constant 0 : i32
    %c0_i32_0 = arith.constant 0 : i32
    %c0_i32_1 = arith.constant 0 : i32
    return %c0_i32, %c0_i32_0 : i32, i32
  }
  func.func @transform_4(%arg0: i32) -> (i32, i32) {
    %c0_i32 = arith.constant 0 : i32
    %c0_i32_0 = arith.constant 0 : i32
    %c0_i32_1 = arith.constant 0 : i32
    return %c0_i32, %c0_i32_0 : i32, i32
  }
  func.func @transform_5(%arg0: i32) -> (i32, i32) {
    %c0_i32 = arith.constant 0 : i32
    %c0_i32_0 = arith.constant 0 : i32
    return %arg0, %c0_i32 : i32, i32
  }
}

</mosaic_0001>

<bundles_post_ra>
// kernel: tpu_custom_call.1
= control target key start
LH: loop header
LB: loop body
LE: loop exit
PB: predicated region body
PF: predicated region fallthrough
CT: control target
= control target key end

     0   :  { %vm29_vm0 = vcmask 261120   ;;  %vm63_vm1 = vcmask 1042432   ;;  %vm59_vm2 = vcmask 23552   ;;  %s154_s1 = inlined_call_operand.vmem [shape: f32[32,3], index: 1, kind: input, shape index: {}]   ;;  %s155_s2 = inlined_call_operand.vmem [shape: f32[1,3], index: 2, kind: input, shape index: {}]   ;;  %s156_s0 = inlined_call_operand.vmem [shape: f32[8,32], index: 0, kind: input, shape index: {}]   ;;  %s157_s4 = inlined_call_operand.vmem [shape: f32[1,3], index: 4, kind: input, shape index: {}]   ;;  %s158_s3 = inlined_call_operand.vmem [shape: f32[3,3], index: 3, kind: input, shape index: {}]   ;;  %s159_s5 = inlined_call_operand.vmem [shape: f32[8,3], index: 5, kind: output, shape index: {}]  }
   0x1   :  { %v24_v0 = vld [vmem:[%s154_s1 + $0x18] sm:$0xff]  ;;  %v23_v1 = vld [vmem:[%s154_s1 + $0x10] sm:$0xff]  ;;  %v22_v2 = vld [vmem:[%s154_s1 + $0x8] sm:$0xff] }
   0x2   :  { %45 = vmatpush.msra.mxu0 %v24_v0  ;;  %v21_v3 = vld [vmem:[%s154_s1] sm:$0xff] }
   0x3   :  { %v20_v4 = vld [vmem:[%s156_s0] sm:$0xff] }
   0x4   :  { %46 = vmatpush.msra.mxu0 %v23_v1  ;;  %v54_v5 = vld [vmem:[%s158_s3] sm:$0x7] }
   0x5   :  { %93 = vmatpush.msk.msra.mxu1 %vm63_vm1, %v54_v5  ;;  %v95_v6 = vld [vmem:[%s155_s2] ss:$0 sm:$0xff] }
   0x6   :  { %47 = vmatpush.msra.mxu0 %v22_v2  ;;  %v96_v10 = vld [vmem:[%s157_s4] ss:$0 sm:$0xff] }
   0x8   :  { %48 = vmatpush.msra.mxu0 %v21_v3 }
   0x9   :  { %92 = vmatmul.msk.f32.vlgmr.msra.gmra.mxu0 %vm29_vm0, %v20_v4 }
  0x86   :  { %v50_v7 = vpop.f32.mrf.mxu0 }
  0x87   :  { %v51_v8 = vadd.f32 %v95_v6, %v50_v7 }
  0x89   :  { %v53_v9 = vmax.f32 %v51_v8, 0.0 }
  0x8b   :  { %94 = vmatmul.msk.f32.vlgmr.msra.gmra.mxu1 %vm59_vm2, %v53_v9 }
 0x108   :  { %v84_v11 = vpop.f32.mrf.mxu1 }
 0x109   :  { %v85_v12 = vadd.f32 %v96_v10, %v84_v11 }
 0x10b   :  { %87 = vst.msk [vmem:[%s159_s5] sm:$0xff] %vm59_vm2, %v85_v12 }

</bundles_post_ra>
